<compile_context>
chip_gen: v5e
topology: v5e:2x2
jax: 0.10.0
libtpu: 0.0.40
codegen_flags: <defaults>
</compile_context>

<pallas_src>
import functools

import numpy as np
import jax
import jax.numpy as jnp
from jax.experimental import pallas as pl
from jax.experimental.pallas import tpu as pltpu


# -----------------------------------------------------------------------------
# Host-side constant operators (cached per shape, built once per (H, W, Ch)).
# -----------------------------------------------------------------------------
@functools.lru_cache(maxsize=None)
def _bilinear_matrix(n):
    """1-D interpolation matrix (2n, n) for scale_factor=2, align_corners=False,
    matching torch.nn.Upsample(mode='bilinear')."""
    m = np.zeros((2 * n, n), dtype=np.float32)
    for i in range(2 * n):
        src = (i + 0.5) / 2.0 - 0.5
        src = max(src, 0.0)
        i0 = min(int(np.floor(src)), n - 1)
        i1 = min(i0 + 1, n - 1)
        frac = src - i0
        m[i, i0] += 1.0 - frac
        m[i, i1] += frac
    return m


@functools.lru_cache(maxsize=None)
def _interp_operators(H, W, Ch):
    """Separable bilinear operators.

    Uh0/Uh1: (H, H) interpolation along H for even / odd output rows.
    Kw:      (W*Ch, 2W*Ch) = kron(Uw^T, I_Ch): W-axis interpolation as a right
             matmul, keeping channels on the lane dimension.
    """
    Uh = _bilinear_matrix(H)                              # (2H, H)
    Uw = _bilinear_matrix(W)                              # (2W, W)
    Uh0 = np.ascontiguousarray(Uh[0::2])                  # rows 2h
    Uh1 = np.ascontiguousarray(Uh[1::2])                  # rows 2h+1
    Kw = np.kron(Uw.T, np.eye(Ch, dtype=np.float32))      # (W*Ch, 2W*Ch)
    return Uh0, Uh1, Kw


def _pick_tile(n, candidates, min_steps=1):
    """Largest candidate dividing n that leaves >= min_steps grid steps (so v7x's
    two TensorCores both get work), falling back to any divisor, then n itself."""
    # TODO(synk): for non-divisible n prefer a pl.cdiv grid with masking instead of
    #             silently falling back to a whole-dimension block.
    for t in candidates:
        if t <= n and n % t == 0 and n // t >= min_steps:
            return t
    for t in candidates:
        if t <= n and n % t == 0:
            return t
    return n


def _ceil_mib(nbytes):
    return int(-(-int(nbytes) // (1 << 20))) << 20


def _vmem_limit(pipelined_bytes, resident_bytes, value_bytes):
    """Computed VMEM budget: double-buffered pipelined blocks + (default
    double-buffered) resident weights + in-flight intermediates, with 2x headroom
    for Mosaic-internal temporaries.  Floor 4 MiB."""
    need = 2 * pipelined_bytes + 2 * resident_bytes + value_bytes
    return max(4 << 20, _ceil_mib(2 * need))


# -----------------------------------------------------------------------------
# Stage 1 (row-tiled over N = B*H*W): ONE fused input dot for both branches
# (conv1_p permuted + conv1_b), vectorised bias + PReLU, then ONE fused downstream
# dot producing [p0 | p1 | zb] in 5Ch lanes, split into three outputs so the
# inter-stage (N, c) -> (B, H, W*c) reshapes stay free.
# -----------------------------------------------------------------------------
def _stage1_kernel(x_ref, wcat_ref, bias_ref, alpha_ref, wfuse_ref,
                   p0_ref, p1_ref, zb_ref):
    ch = zb_ref.shape[-1]
    x = x_ref[...]                                                     # (TN, C) bf16
    # Fused conv1 of both branches: lanes [yp (4Ch, permuted for PixelShuffle) | yb (2Ch)].
    y = jnp.dot(x, wcat_ref[...], preferred_element_type=jnp.float32)  # (TN, 6Ch)
    y = y + bias_ref[...]                                              # bias only on yb lanes
    y = jnp.where(y > 0, y, alpha_ref[...] * y).astype(jnp.bfloat16)   # per-branch PReLU
    # Fused (pixel-shuffle conv2 + final conv) and (conv2_b + final conv) block-diag dot.
    s = jnp.dot(y, wfuse_ref[...], preferred_element_type=jnp.float32)  # (TN, 5Ch)
    p0_ref[...] = s[:, : 2 * ch].astype(p0_ref.dtype)          # even output rows
    p1_ref[...] = s[:, 2 * ch: 4 * ch].astype(p1_ref.dtype)    # odd output rows
    zb_ref[...] = s[:, 4 * ch:].astype(zb_ref.dtype)           # low-res up_b tensor


# -----------------------------------------------------------------------------
# Stage 2 (grid = (B, row tiles)): separable bilinear upsample of zb plus the
# precomputed up_p contribution.  Two MXU dots (Uh even/odd stacked, then Kw) and
# a single full-width lane-dense store (TH, 4*W*Ch).
# -----------------------------------------------------------------------------
def _stage2_kernel(p0_ref, p1_ref, zb_ref, uh0_ref, uh1_ref, kw_ref, out_ref):
    th = uh0_ref.shape[0]
    uh = jnp.concatenate([uh0_ref[...], uh1_ref[...]], axis=0)          # (2TH, H) bf16
    a = jnp.dot(uh, zb_ref[...], preferred_element_type=jnp.float32)    # (2TH, W*Ch)
    b = jnp.dot(a.astype(jnp.bfloat16), kw_ref[...],
                preferred_element_type=jnp.float32)                     # (2TH, 2W*Ch)
    even = b[:th] + p0_ref[...].astype(jnp.float32)
    odd = b[th:] + p1_ref[...].astype(jnp.float32)
    out_ref[...] = jnp.concatenate([even, odd], axis=-1).astype(out_ref.dtype)


# -----------------------------------------------------------------------------
# Wrapper
# -----------------------------------------------------------------------------
@functools.partial(jax.jit, static_argnums=(2, 3))
def upsample_forward(x, params, H, W):
    B, L, C = x.shape
    assert L == H * W and C % 2 == 0
    Ch = C // 2
    N = B * L
    WCh = W * Ch

    # ---- host-side weight folding (tiny) ------------------------------------
    # PixelShuffle channel permutation: new channel (2i+j)*Ch + c <- old c*4 + 2i + j
    perm = (np.arange(4)[:, None] + 4 * np.arange(Ch)[None, :]).reshape(-1)
    wp1p_t = params["wp1"][perm, :].T                                   # (C, 4Ch)
    wb1_t = params["wb1"].T                                             # (C, C)
    wcat = jnp.concatenate([wp1p_t, wb1_t], axis=1).astype(jnp.bfloat16)  # (C, 6Ch)

    bias_vec = jnp.concatenate(
        [jnp.zeros((4 * Ch,), jnp.float32),
         params["bb1"].astype(jnp.float32)]).reshape(1, 6 * Ch)

    a_p = jnp.asarray(params["alpha_p"], jnp.float32)
    a_b = jnp.asarray(params["alpha_b"], jnp.float32)
    alpha_vec = jnp.concatenate(
        [jnp.ones((4 * Ch,), jnp.float32) * a_p,
         jnp.ones((C,), jnp.float32) * a_b]).reshape(1, 6 * Ch)

    wconv = params["wconv"]
    wp_fused = params["wp2"].T @ wconv[:, :Ch].T                        # (Ch, Ch)
    wb_fused = params["wb2"].T @ wconv[:, Ch:].T                        # (C, Ch)
    wfuse = jnp.zeros((6 * Ch, 5 * Ch), jnp.float32)
    wfuse = wfuse.at[:4 * Ch, :4 * Ch].set(
        jnp.kron(jnp.eye(4, dtype=jnp.float32), wp_fused))
    wfuse = wfuse.at[4 * Ch:, 4 * Ch:].set(wb_fused)
    wfuse = wfuse.astype(jnp.bfloat16)                                  # (6Ch, 5Ch)

    # ---- stage 1 -------------------------------------------------------------
    x_flat = x.reshape(N, C).astype(jnp.bfloat16)      # bf16 feed: half HBM traffic
    TN = _pick_tile(N, (8192, 4096, 2048, 1024, 512, 256, 128, 64, 32, 16, 8),
                    min_steps=2)
    pipelined1 = TN * C * 2 + 2 * (TN * 2 * Ch * 2) + TN * Ch * 2
    resident1 = C * 6 * Ch * 2 + 2 * (6 * Ch * 4) + 6 * Ch * 5 * Ch * 2
    values1 = TN * 6 * Ch * 4 + TN * 5 * Ch * 4
    vmem1 = _vmem_limit(pipelined1, resident1, values1)

    p0, p1, zb = pl.pallas_call(
        _stage1_kernel,
        grid=(N // TN,),
        out_shape=(
            jax.ShapeDtypeStruct((N, 2 * Ch), jnp.bfloat16),
            jax.ShapeDtypeStruct((N, 2 * Ch), jnp.bfloat16),
            jax.ShapeDtypeStruct((N, Ch), jnp.bfloat16),
        ),
        in_specs=[
            pl.BlockSpec((TN, C), lambda i: (i, 0)),              # x rows (bf16)
            pl.BlockSpec((C, 6 * Ch), lambda i: (0, 0)),          # fused conv1 weights
            pl.BlockSpec((1, 6 * Ch), lambda i: (0, 0)),          # [0 | bb1]
            pl.BlockSpec((1, 6 * Ch), lambda i: (0, 0)),          # [alpha_p | alpha_b]
            pl.BlockSpec((6 * Ch, 5 * Ch), lambda i: (0, 0)),     # fused downstream weights
        ],
        out_specs=(
            pl.BlockSpec((TN, 2 * Ch), lambda i: (i, 0)),
            pl.BlockSpec((TN, 2 * Ch), lambda i: (i, 0)),
            pl.BlockSpec((TN, Ch), lambda i: (i, 0)),
        ),
        compiler_params=pltpu.CompilerParams(
            dimension_semantics=("parallel",),
            vmem_limit_bytes=vmem1),
    )(x_flat, wcat, bias_vec, alpha_vec, wfuse)

    # Free row-major reshapes only -- no transposes / shuffles between stages.
    p0r = p0.reshape(B, H, 2 * WCh)
    p1r = p1.reshape(B, H, 2 * WCh)
    zbr = zb.reshape(B, H, WCh)

    # ---- stage 2 -------------------------------------------------------------
    Uh0, Uh1, Kw = _interp_operators(H, W, Ch)
    uh0 = jnp.asarray(Uh0, jnp.bfloat16)
    uh1 = jnp.asarray(Uh1, jnp.bfloat16)
    kw = jnp.asarray(Kw, jnp.bfloat16)

    TH = _pick_tile(H, (128, 64, 32, 16, 8), min_steps=1 if B > 1 else 2)
    pipelined2 = 2 * (TH * 2 * WCh * 2) + H * WCh * 2 + TH * 4 * WCh * 4
    resident2 = 2 * (TH * H * 2) + WCh * 2 * WCh * 2
    values2 = 2 * TH * WCh * 4 + 2 * TH * 2 * WCh * 4 + 3 * (TH * 4 * WCh * 4)
    vmem2 = _vmem_limit(pipelined2, resident2, values2)

    out = pl.pallas_call(
        _stage2_kernel,
        grid=(B, H // TH),
        out_shape=jax.ShapeDtypeStruct((B, H, 4 * WCh), jnp.float32),
        in_specs=[
            pl.BlockSpec((None, TH, 2 * WCh), lambda b, t: (b, t, 0)),  # up_p even rows
            pl.BlockSpec((None, TH, 2 * WCh), lambda b, t: (b, t, 0)),  # up_p odd rows
            pl.BlockSpec((None, H, WCh), lambda b, t: (b, 0, 0)),       # zb (low-res)
            pl.BlockSpec((TH, H), lambda b, t: (t, 0)),                 # Uh even
            pl.BlockSpec((TH, H), lambda b, t: (t, 0)),                 # Uh odd
            pl.BlockSpec((WCh, 2 * WCh), lambda b, t: (0, 0)),          # kron(Uw^T, I)
        ],
        out_specs=pl.BlockSpec((None, TH, 4 * WCh), lambda b, t: (b, t, 0)),
        compiler_params=pltpu.CompilerParams(
            dimension_semantics=("parallel", "parallel"),
            vmem_limit_bytes=vmem2),
    )(p0r, p1r, zbr, uh0, uh1, kw)

    # (B, H, [2, 2W, Ch]) row-major == (B, 4HW, Ch): pure reshape, free.
    return out.reshape(B, 4 * H * W, Ch)


# -----------------------------------------------------------------------------
# Pure-JAX float32 reference of the PyTorch forward (factor=2).
# -----------------------------------------------------------------------------
def _prelu(x, alpha):
    return jnp.where(x > 0, x, alpha * x)


def reference_forward(x, params, H, W):
    B, L, C = x.shape
    Ch = C // 2
    img = x.reshape(B, H, W, C)
    yp = _prelu(jnp.einsum("bhwc,oc->bhwo", img, params["wp1"]), params["alpha_p"])
    p = (
        yp.reshape(B, H, W, Ch, 2, 2)
        .transpose(0, 1, 4, 2, 5, 3)
        .reshape(B, 2 * H, 2 * W, Ch)
    )
    xp = jnp.einsum("bhwc,oc->bhwo", p, params["wp2"])
    yb = _prelu(
        jnp.einsum("bhwc,oc->bhwo", img, params["wb1"]) + params["bb1"], params["alpha_b"]
    )
    Uh = jnp.asarray(_bilinear_matrix(H))
    Uw = jnp.asarray(_bilinear_matrix(W))
    up = jnp.einsum("ih,bhwc->biwc", Uh, yb)
    up = jnp.einsum("jw,biwc->bijc", Uw, up)
    xb = jnp.einsum("bhwc,oc->bhwo", up, params["wb2"])
    cat = jnp.concatenate([xp, xb], axis=-1)
    out = jnp.einsum("bhwc,oc->bhwo", cat, params["wconv"])
    return out.reshape(B, 4 * H * W, Ch)


if __name__ == "__main__":
    B, C, H, W = 2, 16, 8, 8     # in_channels=16, input_resolution=8, factor=2
    L = H * W
    key = jax.random.PRNGKey(0)
    ks = jax.random.split(key, 7)
    params = {
        "wp1": jax.random.normal(ks[0], (2 * C, C), jnp.float32) * 0.1,        # up_p conv1
        "wp2": jax.random.normal(ks[1], (C // 2, C // 2), jnp.float32) * 0.1,  # up_p conv2
        "wb1": jax.random.normal(ks[2], (C, C), jnp.float32) * 0.1,            # up_b conv1
        "bb1": jax.random.normal(ks[3], (C,), jnp.float32) * 0.1,              # up_b bias
        "wb2": jax.random.normal(ks[4], (C // 2, C), jnp.float32) * 0.1,       # up_b conv2
        "wconv": jax.random.normal(ks[5], (C // 2, C), jnp.float32) * 0.1,     # final conv
        "alpha_p": 0.25,  # nn.PReLU() default init (single shared alpha)
        "alpha_b": 0.25,
    }
    x = jax.random.normal(ks[6], (B, L, C), jnp.float32)

    out = jax.block_until_ready(upsample_forward(x, params, H, W))
    ref = reference_forward(x, params, H, W)

    assert out.shape == (B, 4 * L, C // 2)
    # bf16 MXU inputs / bf16 inter-stage intermediates -> loose-but-safe tolerance.
    np.testing.assert_allclose(np.asarray(out), np.asarray(ref), rtol=2e-2, atol=2e-2)
    print("KERNEL_OK")
</pallas_src>

<mosaic_0001>
module attributes {stable_mosaic.version = 11 : i64} {
  func.func @_stage2_kernel(%arg0: i32, %arg1: i32, %arg2: memref<1x8x128xbf16, #tpu.memory_space<vmem>>, %arg3: memref<1x8x128xbf16, #tpu.memory_space<vmem>>, %arg4: memref<1x8x64xbf16, #tpu.memory_space<vmem>>, %arg5: memref<8x8xbf16, #tpu.memory_space<vmem>>, %arg6: memref<8x8xbf16, #tpu.memory_space<vmem>>, %arg7: memref<64x128xbf16, #tpu.memory_space<vmem>>, %arg8: memref<1x8x256xf32, #tpu.memory_space<vmem>>) attributes {dimension_semantics = [#tpu.dimension_semantics<parallel>, #tpu.dimension_semantics<parallel>], iteration_bounds = array<i64: 2, 1>, scalar_prefetch = 0 : i64, scratch_operands = 0 : i64, tpu.core_type = #tpu.core_type<tc>, window_params = [{transform_indices = @transform_0, window_bounds = array<i64: 1, 8, 128>}, {transform_indices = @transform_1, window_bounds = array<i64: 1, 8, 128>}, {transform_indices = @transform_2, window_bounds = array<i64: 1, 8, 64>}, {transform_indices = @transform_3, window_bounds = array<i64: 8, 8>}, {transform_indices = @transform_4, window_bounds = array<i64: 8, 8>}, {pipeline_mode = #tpu.pipeline_mode<synchronous>, transform_indices = @transform_5, window_bounds = array<i64: 64, 128>}, {transform_indices = @transform_6, window_bounds = array<i64: 1, 8, 256>}]} {
    %c0 = arith.constant 0 : index
    %c0_0 = arith.constant 0 : index
    %0 = vector.load %arg5[%c0, %c0_0] : memref<8x8xbf16, #tpu.memory_space<vmem>>, vector<8x8xbf16>
    %c0_1 = arith.constant 0 : index
    %c0_2 = arith.constant 0 : index
    %1 = vector.load %arg6[%c0_1, %c0_2] : memref<8x8xbf16, #tpu.memory_space<vmem>>, vector<8x8xbf16>
    %2 = tpu.concatenate %0, %1 in 0 : vector<8x8xbf16>, vector<8x8xbf16> -> vector<16x8xbf16>
    %c0_3 = arith.constant 0 : index
    %c0_4 = arith.constant 0 : index
    %c0_5 = arith.constant 0 : index
    %3 = vector.load %arg4[%c0_3, %c0_4, %c0_5] : memref<1x8x64xbf16, #tpu.memory_space<vmem>>, vector<1x8x64xbf16>
    %4 = vector.shape_cast %3 : vector<1x8x64xbf16> to vector<8x64xbf16>
    %cst = arith.constant dense<0.000000e+00> : vector<16x64xf32>
    %5 = tpu.matmul %2, %4, %cst {dimension_numbers = #tpu.dot_dimension_numbers<[1], [0], [0], [1], [0, 0, 1, 1], [], []>} : vector<16x8xbf16>, vector<8x64xbf16>, vector<16x64xf32> -> vector<16x64xf32>
    %6 = arith.truncf %5 : vector<16x64xf32> to vector<16x64xbf16>
    %c0_6 = arith.constant 0 : index
    %c0_7 = arith.constant 0 : index
    %7 = vector.load %arg7[%c0_6, %c0_7] : memref<64x128xbf16, #tpu.memory_space<vmem>>, vector<64x128xbf16>
    %cst_8 = arith.constant dense<0.000000e+00> : vector<16x128xf32>
    %8 = tpu.matmul %6, %7, %cst_8 {dimension_numbers = #tpu.dot_dimension_numbers<[1], [0], [0], [1], [0, 0, 1, 1], [], []>} : vector<16x64xbf16>, vector<64x128xbf16>, vector<16x128xf32> -> vector<16x128xf32>
    %9 = vector.extract_strided_slice %8 {offsets = [0, 0], sizes = [8, 128], strides = [1, 1]} : vector<16x128xf32> to vector<8x128xf32>
    %c0_9 = arith.constant 0 : index
    %c0_10 = arith.constant 0 : index
    %c0_11 = arith.constant 0 : index
    %10 = vector.load %arg2[%c0_9, %c0_10, %c0_11] : memref<1x8x128xbf16, #tpu.memory_space<vmem>>, vector<1x8x128xbf16>
    %11 = vector.shape_cast %10 : vector<1x8x128xbf16> to vector<8x128xbf16>
    %12 = arith.extf %11 : vector<8x128xbf16> to vector<8x128xf32>
    %13 = arith.addf %9, %12 : vector<8x128xf32>
    %14 = vector.extract_strided_slice %8 {offsets = [8, 0], sizes = [8, 128], strides = [1, 1]} : vector<16x128xf32> to vector<8x128xf32>
    %c0_12 = arith.constant 0 : index
    %c0_13 = arith.constant 0 : index
    %c0_14 = arith.constant 0 : index
    %15 = vector.load %arg3[%c0_12, %c0_13, %c0_14] : memref<1x8x128xbf16, #tpu.memory_space<vmem>>, vector<1x8x128xbf16>
    %16 = vector.shape_cast %15 : vector<1x8x128xbf16> to vector<8x128xbf16>
    %17 = arith.extf %16 : vector<8x128xbf16> to vector<8x128xf32>
    %18 = arith.addf %14, %17 : vector<8x128xf32>
    %19 = tpu.concatenate %13, %18 in 1 : vector<8x128xf32>, vector<8x128xf32> -> vector<8x256xf32>
    %c0_15 = arith.constant 0 : index
    %c0_16 = arith.constant 0 : index
    %c0_17 = arith.constant 0 : index
    %20 = vector.load %arg8[%c0_15, %c0_16, %c0_17] : memref<1x8x256xf32, #tpu.memory_space<vmem>>, vector<1x8x256xf32>
    %21 = vector.shape_cast %20 : vector<1x8x256xf32> to vector<8x256xf32>
    %22 = vector.shape_cast %19 : vector<8x256xf32> to vector<1x8x256xf32>
    tpu.vector_store %arg8[%c0_15, %c0_16, %c0_17], %22 {strides = array<i32>} : memref<1x8x256xf32, #tpu.memory_space<vmem>>, vector<1x8x256xf32>,
    return
  }
  func.func @transform_0(%arg0: i32, %arg1: i32) -> (i32, i32, i32) {
    %c0_i32 = arith.constant 0 : i32
    %c0_i32_0 = arith.constant 0 : i32
    return %arg0, %arg1, %c0_i32 : i32, i32, i32
  }
  func.func @transform_1(%arg0: i32, %arg1: i32) -> (i32, i32, i32) {
    %c0_i32 = arith.constant 0 : i32
    %c0_i32_0 = arith.constant 0 : i32
    return %arg0, %arg1, %c0_i32 : i32, i32, i32
  }
  func.func @transform_2(%arg0: i32, %arg1: i32) -> (i32, i32, i32) {
    %c0_i32 = arith.constant 0 : i32
    %c0_i32_0 = arith.constant 0 : i32
    %c0_i32_1 = arith.constant 0 : i32
    return %arg0, %c0_i32, %c0_i32_0 : i32, i32, i32
  }
  func.func @transform_3(%arg0: i32, %arg1: i32) -> (i32, i32) {
    %c0_i32 = arith.constant 0 : i32
    %c0_i32_0 = arith.constant 0 : i32
    return %arg1, %c0_i32 : i32, i32
  }
  func.func @transform_4(%arg0: i32, %arg1: i32) -> (i32, i32) {
    %c0_i32 = arith.constant 0 : i32
    %c0_i32_0 = arith.constant 0 : i32
    return %arg1, %c0_i32 : i32, i32
  }
  func.func @transform_5(%arg0: i32, %arg1: i32) -> (i32, i32) {
    %c0_i32 = arith.constant 0 : i32
    %c0_i32_0 = arith.constant 0 : i32
    %c0_i32_1 = arith.constant 0 : i32
    return %c0_i32, %c0_i32_0 : i32, i32
  }
  func.func @transform_6(%arg0: i32, %arg1: i32) -> (i32, i32, i32) {
    %c0_i32 = arith.constant 0 : i32
    %c0_i32_0 = arith.constant 0 : i32
    return %arg0, %arg1, %c0_i32 : i32, i32, i32
  }
}

module attributes {stable_mosaic.version = 11 : i64} {
  func.func @_stage1_kernel(%arg0: i32, %arg1: memref<64x16xbf16, #tpu.memory_space<vmem>>, %arg2: memref<16x48xbf16, #tpu.memory_space<vmem>>, %arg3: memref<1x48xf32, #tpu.memory_space<vmem>>, %arg4: memref<1x48xf32, #tpu.memory_space<vmem>>, %arg5: memref<48x40xbf16, #tpu.memory_space<vmem>>, %arg6: memref<64x16xbf16, #tpu.memory_space<vmem>>, %arg7: memref<64x16xbf16, #tpu.memory_space<vmem>>, %arg8: memref<64x8xbf16, #tpu.memory_space<vmem>>) attributes {dimension_semantics = [#tpu.dimension_semantics<parallel>], iteration_bounds = array<i64: 2>, scalar_prefetch = 0 : i64, scratch_operands = 0 : i64, tpu.core_type = #tpu.core_type<tc>, window_params = [{transform_indices = @transform_0, window_bounds = array<i64: 64, 16>}, {pipeline_mode = #tpu.pipeline_mode<synchronous>, transform_indices = @transform_1, window_bounds = array<i64: 16, 48>}, {pipeline_mode = #tpu.pipeline_mode<synchronous>, transform_indices = @transform_2, window_bounds = array<i64: 1, 48>}, {pipeline_mode = #tpu.pipeline_mode<synchronous>, transform_indices = @transform_3, window_bounds = array<i64: 1, 48>}, {pipeline_mode = #tpu.pipeline_mode<synchronous>, transform_indices = @transform_4, window_bounds = array<i64: 48, 40>}, {transform_indices = @transform_5, window_bounds = array<i64: 64, 16>}, {transform_indices = @transform_6, window_bounds = array<i64: 64, 16>}, {transform_indices = @transform_7, window_bounds = array<i64: 64, 8>}]} {
    %c0 = arith.constant 0 : index
    %c0_0 = arith.constant 0 : index
    %0 = vector.load %arg1[%c0, %c0_0] : memref<64x16xbf16, #tpu.memory_space<vmem>>, vector<64x16xbf16>
    %c0_1 = arith.constant 0 : index
    %c0_2 = arith.constant 0 : index
    %1 = vector.load %arg2[%c0_1, %c0_2] : memref<16x48xbf16, #tpu.memory_space<vmem>>, vector<16x48xbf16>
    %cst = arith.constant dense<0.000000e+00> : vector<64x48xf32>
    %2 = tpu.matmul %0, %1, %cst {dimension_numbers = #tpu.dot_dimension_numbers<[1], [0], [0], [1], [0, 0, 1, 1], [], []>} : vector<64x16xbf16>, vector<16x48xbf16>, vector<64x48xf32> -> vector<64x48xf32>
    %c0_3 = arith.constant 0 : index
    %c0_4 = arith.constant 0 : index
    %3 = vector.load %arg3[%c0_3, %c0_4] : memref<1x48xf32, #tpu.memory_space<vmem>>, vector<1x48xf32>
    %4 = vector.broadcast %3 : vector<1x48xf32> to vector<64x48xf32>
    %5 = arith.addf %2, %4 : vector<64x48xf32>
    %cst_5 = arith.constant 0.000000e+00 : f32
    %6 = vector.broadcast %cst_5 : f32 to vector<64x48xf32>
    %7 = arith.cmpf ogt, %5, %6 : vector<64x48xf32>
    %c0_6 = arith.constant 0 : index
    %c0_7 = arith.constant 0 : index
    %8 = vector.load %arg4[%c0_6, %c0_7] : memref<1x48xf32, #tpu.memory_space<vmem>>, vector<1x48xf32>
    %9 = vector.broadcast %8 : vector<1x48xf32> to vector<64x48xf32>
    %10 = arith.mulf %9, %5 : vector<64x48xf32>
    %11 = arith.select %7, %5, %10 : vector<64x48xi1>, vector<64x48xf32>
    %12 = arith.truncf %11 : vector<64x48xf32> to vector<64x48xbf16>
    %c0_8 = arith.constant 0 : index
    %c0_9 = arith.constant 0 : index
    %13 = vector.load %arg5[%c0_8, %c0_9] : memref<48x40xbf16, #tpu.memory_space<vmem>>, vector<48x40xbf16>
    %cst_10 = arith.constant dense<0.000000e+00> : vector<64x40xf32>
    %14 = tpu.matmul %12, %13, %cst_10 {dimension_numbers = #tpu.dot_dimension_numbers<[1], [0], [0], [1], [0, 0, 1, 1], [], []>} : vector<64x48xbf16>, vector<48x40xbf16>, vector<64x40xf32> -> vector<64x40xf32>
    %15 = vector.extract_strided_slice %14 {offsets = [0, 0], sizes = [64, 16], strides = [1, 1]} : vector<64x40xf32> to vector<64x16xf32>
    %16 = arith.truncf %15 : vector<64x16xf32> to vector<64x16xbf16>
    %c0_11 = arith.constant 0 : index
    %c0_12 = arith.constant 0 : index
    %17 = vector.load %arg6[%c0_11, %c0_12] : memref<64x16xbf16, #tpu.memory_space<vmem>>, vector<64x16xbf16>
    tpu.vector_store %arg6[%c0_11, %c0_12], %16 {strides = array<i32>} : memref<64x16xbf16, #tpu.memory_space<vmem>>, vector<64x16xbf16>,
    %18 = vector.extract_strided_slice %14 {offsets = [0, 16], sizes = [64, 16], strides = [1, 1]} : vector<64x40xf32> to vector<64x16xf32>
    %19 = arith.truncf %18 : vector<64x16xf32> to vector<64x16xbf16>
    %c0_13 = arith.constant 0 : index
    %c0_14 = arith.constant 0 : index
    %20 = vector.load %arg7[%c0_13, %c0_14] : memref<64x16xbf16, #tpu.memory_space<vmem>>, vector<64x16xbf16>
    tpu.vector_store %arg7[%c0_13, %c0_14], %19 {strides = array<i32>} : memref<64x16xbf16, #tpu.memory_space<vmem>>, vector<64x16xbf16>,
    %21 = vector.extract_strided_slice %14 {offsets = [0, 32], sizes = [64, 8], strides = [1, 1]} : vector<64x40xf32> to vector<64x8xf32>
    %22 = arith.truncf %21 : vector<64x8xf32> to vector<64x8xbf16>
    %c0_15 = arith.constant 0 : index
    %c0_16 = arith.constant 0 : index
    %23 = vector.load %arg8[%c0_15, %c0_16] : memref<64x8xbf16, #tpu.memory_space<vmem>>, vector<64x8xbf16>
    tpu.vector_store %arg8[%c0_15, %c0_16], %22 {strides = array<i32>} : memref<64x8xbf16, #tpu.memory_space<vmem>>, vector<64x8xbf16>,
    return
  }
  func.func @transform_0(%arg0: i32) -> (i32, i32) {
    %c0_i32 = arith.constant 0 : i32
    %c0_i32_0 = arith.constant 0 : i32
    return %arg0, %c0_i32 : i32, i32
  }
  func.func @transform_1(%arg0: i32) -> (i32, i32) {
    %c0_i32 = arith.constant 0 : i32
    %c0_i32_0 = arith.constant 0 : i32
    %c0_i32_1 = arith.constant 0 : i32
    return %c0_i32, %c0_i32_0 : i32, i32
  }
  func.func @transform_2(%arg0: i32) -> (i32, i32) {
    %c0_i32 = arith.constant 0 : i32
    %c0_i32_0 = arith.constant 0 : i32
    %c0_i32_1 = arith.constant 0 : i32
    return %c0_i32, %c0_i32_0 : i32, i32
  }
  func.func @transform_3(%arg0: i32) -> (i32, i32) {
    %c0_i32 = arith.constant 0 : i32
    %c0_i32_0 = arith.constant 0 : i32
    %c0_i32_1 = arith.constant 0 : i32
    return %c0_i32, %c0_i32_0 : i32, i32
  }
  func.func @transform_4(%arg0: i32) -> (i32, i32) {
    %c0_i32 = arith.constant 0 : i32
    %c0_i32_0 = arith.constant 0 : i32
    %c0_i32_1 = arith.constant 0 : i32
    return %c0_i32, %c0_i32_0 : i32, i32
  }
  func.func @transform_5(%arg0: i32) -> (i32, i32) {
    %c0_i32 = arith.constant 0 : i32
    %c0_i32_0 = arith.constant 0 : i32
    return %arg0, %c0_i32 : i32, i32
  }
  func.func @transform_6(%arg0: i32) -> (i32, i32) {
    %c0_i32 = arith.constant 0 : i32
    %c0_i32_0 = arith.constant 0 : i32
    return %arg0, %c0_i32 : i32, i32
  }
  func.func @transform_7(%arg0: i32) -> (i32, i32) {
    %c0_i32 = arith.constant 0 : i32
    %c0_i32_0 = arith.constant 0 : i32
    return %arg0, %c0_i32 : i32, i32
  }
}

</mosaic_0001>

<bundles_post_ra>
// kernel: mul.16
= control target key start
LH: loop header
LB: loop body
LE: loop exit
PB: predicated region body
PF: predicated region fallthrough
CT: control target
= control target key end

     0   :  { %s20_s0 = inlined_call_operand.<no memory space> [shape: f32[], index: 0, kind: input, shape index: {}]   ;;  %s21_s1 = inlined_call_operand.vmem [shape: f32[32], index: 1, kind: output, shape index: {}]  }
   0x1   :  { %v2_v0 = vstv %s20_s0 }
   0x2   :  { %3 = vst [vmem:[%s21_s1] sm:$0x1] %v2_v0 }

// kernel: upsample_forward.3
= control target key start
LH: loop header
LB: loop body
LE: loop exit
PB: predicated region body
PF: predicated region fallthrough
CT: control target
= control target key end

     0   :  { %s715_s21 = smov 0   ;;  %s717_s22 = smov 0   ;;  %s781_s0 = inlined_call_operand.vmem [shape: bf16[2,8,128], index: 0, kind: input, shape index: {}]   ;;  %s782_s1 = inlined_call_operand.vmem [shape: bf16[2,8,128], index: 1, kind: input, shape index: {}]   ;;  %s783_s2 = inlined_call_operand.vmem [shape: bf16[2,8,64], index: 2, kind: input, shape index: {}]   ;;  %s784_s3 = inlined_call_operand.vmem [shape: bf16[8,8], index: 3, kind: input, shape index: {}]   ;;  %s785_s4 = inlined_call_operand.vmem [shape: bf16[8,8], index: 4, kind: input, shape index: {}]   ;;  %s786_s5 = inlined_call_operand.vmem [shape: bf16[64,128], index: 5, kind: input, shape index: {}]   ;;  %s787_s6 = inlined_call_operand.vmem [shape: f32[2,8,256], index: 6, kind: output, shape index: {}]  }
   0x1   :  { %s719_s23 = smov 0  }
   0x2 LB: > { %s28_s24 = sadd.s32 1, %s674_s22  ;;  %p601_p0 = scmp.ge.s32.totalorder %s678_s23, 1  ;;  %s678_s23 = sphi %s719_s23, %s16_s23   ;;  %s674_s22 = sphi %s717_s22, %s789_s22   ;;  %s670_s21 = sphi %s715_s21, %s788_s21  }
   0x3   : > { %p30_p1 = scmp.ge.s32.totalorder %s28_s24, 2  ;;  %p271_p2 = scmp.lt.s32.totalorder %s678_s23, 3 }
   0x5   : > { %s791_s24 = smov (%p30_p1, %s28_s24), 0  ;;  %p272_p3 = pnand %p601_p0, %p271_p2 }
   0x6   : > { %p326_p4 = scmp.lt.s32.totalorder (!%p272_p3), %s670_s21, 1 }
   0x7   : > { %275 = sbr.rel (%p272_p3) target bundleno = 293 (0x125), region = 44 }
   0xc   : > { %v363_v0 = vld [vmem:[%s785_s4] sm:$0xf]  ;;  %v631_v2 = vld [vmem:[%s786_s5 + $0x18] sm:$0xff]  ;;  %s793_s21 = smov (!%p326_p4, %s670_s21), 1  ;;  %vm367_vm0 = vcmask 1043456   ;;  %vm372_vm1 = vcmask 64512  }
   0xd   : > { %v365_v1 = vunpack.c.l.b16 %v363_v0  ;;  %433 = vmatpush.bf16.msra.mxu1 %v631_v2  ;;  %s742_s29 = sshll.u32 %s793_s21, 2  ;;  %v362_v4 = vld [vmem:[%s784_s3] sm:$0xf]  ;;  %v630_v8 = vld [vmem:[%s786_s5 + $0x10] sm:$0xff]  ;;  %v629_v9 = vld [vmem:[%s786_s5 + $0x8] sm:$0xff]  ;;  %vm425_vm2 = vcmask 523264  }
   0xe   : > { %s343_s8 = scalar_lea.vmem %s783_s2, %s742_s29  ;;  %v628_v10 = vld [vmem:[%s786_s5] sm:$0xff]  ;;  %s332_s19 = scalar_lea.vmem %s781_s0, %s742_s29 }
   0xf   : > { %v366_v3 = vpack.c.b16 %v365_v1, %v365_v1  ;;  %v371_v5 = vld [vmem:[%s343_s8] sm:$0xf]  ;;  %s627_s20 = sshll.u32 %s793_s21, 4  ;;  %s339_s27 = scalar_lea.vmem %s782_s1, %s742_s29 }
  0x10   : > { %v376_v6 = vsel %vm367_vm0, %v371_v5, 0  ;;  %v443_v14 = vld [vmem:[%s332_s19] sm:$0xf]  ;;  %s360_s7 = scalar_lea.vmem %s787_s6, %s627_s20 }
  0x11   : > { %385 = vmatpush.bf16.msra.mxu0 %v376_v6  ;;  %v370_v7 = vsel %vm367_vm0, %v362_v4, %v366_v3  ;;  %434 = vmatpush.bf16.msra.mxu1 %v630_v8  ;;  %v444_v15 = vunpack.c.l.bf16 %v443_v14  ;;  %v446_v18 = vld [vmem:[%s339_s27] sm:$0xf] }
  0x12   : > { %v447_v19 = vunpack.c.l.bf16 %v446_v18 }
  0x14   : > { %607 = vmatmul.msk.bf16.vlgmr.msra.gmra.mxu0 %vm372_vm1, %v370_v7 }
  0x15   : > { %435 = vmatpush.bf16.msra.mxu1 %v629_v9 }
  0x19   : > { %436 = vmatpush.bf16.msra.mxu1 %v628_v10 }
  0x91   : > { %v387_v11 = vpop.f32.mrf.mxu0 }
  0x99   : > { %v389_v12 = vpop.f32.mrf.mxu0 }
  0x9a   : > { %v392_v13 = vpack.c.bf16 %v389_v12, %v387_v11 }
  0x9c   : > { %624 = vmatmul.msk.bf16.vlgmr.msra.gmra.mxu1 %vm425_vm2, %v392_v13 }
 0x119   : > { %v438_v16 = vpop.f32.mrf.mxu1 }
 0x11a   : > { %v445_v17 = vadd.f32 %v444_v15, %v438_v16 }
 0x11c   : > { %449 = vst [vmem:[%s360_s7] sm:$0xff] %v445_v17 }
 0x121   : > { %v440_v20 = vpop.f32.mrf.mxu1 }
 0x122   : > { %v448_v21 = vadd.f32 %v447_v19, %v440_v20 }
 0x124   : > { %450 = vst [vmem:[%s360_s7 + $0x8] sm:$0xff] %v448_v21 }
 0x125 PF: > { %s16_s23 = sadd.s32 1, %s678_s23   ;;  %s788_s21 = smov %s674_s22 }
 0x126   : > { %p13_p5 = scmp.ge.s32.totalorder %s16_s23, 4   ;;  %s789_s22 = smov %s791_s24 }
 0x128   :  { %15 = sbr.rel (!%p13_p5) target bundleno = 2 (0x2), region = 86 }

// kernel: upsample_forward.2
= control target key start
LH: loop header
LB: loop body
LE: loop exit
PB: predicated region body
PF: predicated region fallthrough
CT: control target
= control target key end

     0   :  { %s833_s24 = smov 0   ;;  %s944_s0 = inlined_call_operand.vmem [shape: bf16[128,16], index: 0, kind: input, shape index: {}]   ;;  %s945_s1 = inlined_call_operand.vmem [shape: bf16[16,48], index: 1, kind: input, shape index: {}]   ;;  %s946_s2 = inlined_call_operand.vmem [shape: f32[1,48], index: 2, kind: input, shape index: {}]   ;;  %s947_s3 = inlined_call_operand.vmem [shape: f32[1,48], index: 3, kind: input, shape index: {}]   ;;  %s948_s4 = inlined_call_operand.vmem [shape: bf16[48,40], index: 4, kind: input, shape index: {}]   ;;  %s949_s5 = inlined_call_operand.vmem [shape: bf16[128,16], index: 5, kind: output, shape index: {0}]   ;;  %s950_s6 = inlined_call_operand.vmem [shape: bf16[128,16], index: 6, kind: output, shape index: {1}]   ;;  %s951_s7 = inlined_call_operand.vmem [shape: bf16[128,8], index: 7, kind: output, shape index: {2}]  }
   0x1 LB: > { %s704_s25 = sadd.s32 4294967295, %s789_s24   ;;  %p708_p0 = scmp.ge.s32.totalorder %s789_s24, 1  ;;  %s789_s24 = sphi %s833_s24, %s18_s24  }
   0x2   : > { %p243_p1 = scmp.lt.s32.totalorder %s789_s24, 3 }
   0x4   : > { %p244_p2 = pnand %p708_p0, %p243_p1 }
   0x5   : > { %s709_s28 = sshll.u32 (!%p244_p2), %s704_s25, 3  ;;  %s791_s23 = smov (!%p244_p2), 112  }
   0x6   : > { %247 = sbr.rel (%p244_p2) target bundleno = 460 (0x1cc), region = 40  ;;  %p286_p3 = scmp.lt.s32.totalorder (!%p244_p2), %s709_s28, 15 }
   0x7   : > { %s792_s25 = smov (!%p244_p2), 96  }
   0xb   : > { %v763_v0 = vld [vmem:[%s945_s1] sm:$0xff]  ;;  %s953_s28 = smov (!%p286_p3, %s709_s28), 15  ;;  %vm350_vm0 = vcmask 130048   ;;  %v766_v5 = vld [vmem:[%s948_s4 + $0x10] sm:$0xff]  ;;  %v765_v6 = vld [vmem:[%s948_s4 + $0x8] sm:$0xff]  ;;  %vm448_vm3 = vcmask 392192  }
   0xc   : > { %370 = vmatpush.bf16.msra.mxu0 %v763_v0  ;;  %767 = vmatpush.bf16.msra.mxu3 %v763_v0  ;;  %s844_s29 = sshll.u32 %s953_s28, 2  ;;  %v764_v7 = vld [vmem:[%s948_s4] sm:$0xff]  ;;  %vm498_vm10 = vcmask 125952   ;;  %vm571_vm11 = vcmask 60416  }
   0xd   : > { %s289_s9 = scalar_lea.vmem %s944_s0, %s844_s29  ;;  %466 = vmatpush.bf16.msra.mxu1 %v766_v5  ;;  %768 = vmatpush.bf16.msra.mxu2 %v766_v5  ;;  %v781_v9 = vld [vmem:[%s946_s2] ss:$0 sm:$0xff]  ;;  %s873_s22 = scalar_lea.vmem %s949_s5, %s844_s29 }
   0xe   : > { %v759_v1 = vld [vmem:[%s289_s9] sm:$0xff]  ;;  %v760_v2 = vld [vmem:[%s289_s9 + $0x8] sm:$0xff]  ;;  %v761_v3 = vld [vmem:[%s289_s9 + $0x10] sm:$0xff]  ;;  %s911_s28 = scalar_lea.vmem %s951_s7, %s844_s29 }
   0xf   : > { %737 = vmatmul.msk.bf16.vlgmr.msra.gmra.mxu0 %vm350_vm0, %v759_v1  ;;  %738 = vmatmul.msk.bf16.vlgmr.msra.gmra.mxu3 %vm350_vm0, %v760_v2  ;;  %v762_v4 = vld [vmem:[%s289_s9 + $0x18] sm:$0xff]  ;;  %v782_v11 = vld [vmem:[%s947_s3] ss:$0 sm:$0xff]  ;;  %s301_s9 = scalar_lea.vmem %s950_s6, %s844_s29 }
  0x11   : > { %467 = vmatpush.bf16.msra.mxu1 %v765_v6  ;;  %769 = vmatpush.bf16.msra.mxu2 %v765_v6 }
  0x15   : > { %468 = vmatpush.bf16.msra.mxu1 %v764_v7  ;;  %770 = vmatpush.bf16.msra.mxu2 %v764_v7 }
  0x1f   : > { %739 = vmatmul.msk.bf16.gmra.mxu3 %vm350_vm0, %v761_v3 }
  0x2f   : > { %740 = vmatmul.msk.bf16.gmra.mxu3 %vm350_vm0, %v762_v4 }
  0x8c   : > { %v372_v8 = vpop.f32.mrf.mxu0 }
  0x8d   : > { %v373_v10 = vadd.f32 %v781_v9, %v372_v8 }
  0x8f   : > { %v404_v13 = vmul.f32 %v782_v11, %v373_v10  ;;  %vm392_vm1 = vcmp.gt.f32.partialorder %v373_v10, 0.0 }
  0x91   : > { %v412_v17 = vsel %vm392_vm1, %v373_v10, %v404_v13 }
  0x92   : > { %v377_v12 = vpop.f32.mrf.mxu3 }
  0x93   : > { %v378_v22 = vadd.f32 %v781_v9, %v377_v12 }
  0x94   : > { %v374_v14 = vpop.f32.mrf.mxu0 }
  0x95   : > { %v375_v15 = vadd.f32 %v781_v9, %v374_v14  ;;  %v406_v25 = vmul.f32 %v782_v11, %v378_v22  ;;  %vm394_vm5 = vcmp.gt.f32.partialorder %v378_v22, 0.0 }
  0x97   : > { %vm393_vm2 = vcmp.gt.f32.partialorder %v375_v15, 0.0  ;;  %v405_v16 = vmul.f32 %v782_v11, %v375_v15  ;;  %v414_v28 = vsel %vm394_vm5, %v378_v22, %v406_v25 }
  0x99   : > { %v413_v18 = vsel %vm393_vm2, %v375_v15, %v405_v16 }
  0x9a   : > { %v379_v19 = vpop.f32.mrf.mxu3  ;;  %v420_v20 = vpack.c.bf16 %v413_v18, %v412_v17 }
  0x9b   : > { %v380_v21 = vadd.f32 %v781_v9, %v379_v19 }
  0x9c   : > { %753 = vmatmul.msk.bf16.vlgmr.msra.gmra.mxu1 %vm448_vm3, %v420_v20 }
  0x9d   : > { %v407_v24 = vmul.f32 %v782_v11, %v380_v21  ;;  %vm395_vm4 = vcmp.gt.f32.partialorder %v380_v21, 0.0 }
  0x9f   : > { %v415_v27 = vsel %vm395_vm4, %v380_v21, %v407_v24 }
  0xa0   : > { %v421_v30 = vpack.c.bf16 %v415_v27, %v414_v28 }
  0xa2   : > { %v382_v23 = vpop.f32.mrf.mxu3 }
  0xa3   : > { %v383_v26 = vadd.f32 %v781_v9, %v382_v23 }
  0xa5   : > { %v408_v31 = vmul.f32 %v782_v11, %v383_v26  ;;  %vm396_vm6 = vcmp.gt.f32.partialorder %v383_v26, 0.0 }
  0xa7   : > { %v416_v34 = vsel %vm396_vm6, %v383_v26, %v408_v31 }
  0xaa   : > { %v384_v29 = vpop.f32.mrf.mxu3 }
  0xab   : > { %v385_v32 = vadd.f32 %v781_v9, %v384_v29 }
  0xac   : > { %754 = vmatmul.msk.bf16.gmra.mxu1 %vm448_vm3, %v421_v30 }
  0xad   : > { %vm397_vm7 = vcmp.gt.f32.partialorder %v385_v32, 0.0  ;;  %v409_v33 = vmul.f32 %v782_v11, %v385_v32 }
  0xaf   : > { %v417_v35 = vsel %vm397_vm7, %v385_v32, %v409_v33 }
  0xb0   : > { %v422_v36 = vpack.c.bf16 %v417_v35, %v416_v34 }
  0xb2   : > { %v387_v37 = vpop.f32.mrf.mxu3  ;;  %755 = vmatmul.msk.bf16.vlgmr.msra.gmra.mxu2 %vm448_vm3, %v422_v36 }
  0xb3   : > { %v388_v38 = vadd.f32 %v781_v9, %v387_v37 }
  0xb5   : > { %v410_v40 = vmul.f32 %v782_v11, %v388_v38  ;;  %vm398_vm8 = vcmp.gt.f32.partialorder %v388_v38, 0.0 }
  0xb7   : > { %v418_v43 = vsel %vm398_vm8, %v388_v38, %v410_v40 }
  0xba   : > { %v389_v39 = vpop.f32.mrf.mxu3 }
  0xbb   : > { %v390_v41 = vadd.f32 %v781_v9, %v389_v39 }
  0xbd   : > { %vm399_vm9 = vcmp.gt.f32.partialorder %v390_v41, 0.0  ;;  %v411_v42 = vmul.f32 %v782_v11, %v390_v41 }
  0xbf   : > { %v419_v44 = vsel %vm399_vm9, %v390_v41, %v411_v42 }
  0xc0   : > { %v423_v45 = vpack.c.bf16 %v419_v44, %v418_v43 }
  0xc2   : > { %756 = vmatmul.msk.bf16.gmra.mxu2 %vm448_vm3, %v423_v45 }
 0x119   : > { %v470_v46 = vpop.f32.mrf.mxu1 }
 0x11a   : > { %v490_v47 = vpack.c.bf16 %v470_v46, %v470_v46 }
 0x11c   : > { %499 = vst.msk [vmem:[%s873_s22] sm:$0xf] %vm498_vm10, %v490_v47  ;;  %515 = vrot.lane.b32.xlu0 %v490_v47, %s791_s23  ;;  %547 = vrot.lane.b32.xlu2 %v490_v47, %s792_s25 }
 0x121   : > { %v472_v48 = vpop.f32.mrf.mxu1 }
 0x122   : > { %v491_v49 = vpack.c.bf16 %v472_v48, %v472_v48 }
 0x124   : > { %500 = vst.msk [vmem:[%s873_s22 + $0x4] sm:$0xf] %vm498_vm10, %v491_v49  ;;  %517 = vrot.lane.b32.xlu0 %v491_v49, %s791_s23 }
 0x129   : > { %v475_v50 = vpop.f32.mrf.mxu1 }
 0x12a   : > { %v492_v51 = vpack.c.bf16 %v475_v50, %v475_v50 }
 0x12c   : > { %501 = vst.msk [vmem:[%s873_s22 + $0x8] sm:$0xf] %vm498_vm10, %v492_v51  ;;  %549 = vrot.lane.b32.xlu0 %v491_v49, %s792_s25  ;;  %519 = vrot.lane.b32.xlu1 %v492_v51, %s791_s23 }
 0x131   : > { %v477_v52 = vpop.f32.mrf.mxu1 }
 0x132   : > { %v493_v53 = vpack.c.bf16 %v477_v52, %v477_v52 }
 0x134   : > { %502 = vst.msk [vmem:[%s873_s22 + $0xc] sm:$0xf] %vm498_vm10, %v493_v53  ;;  %551 = vrot.lane.b32.xlu1 %v492_v51, %s792_s25  ;;  %553 = vrot.lane.b32.xlu2 %v493_v53, %s792_s25 }
 0x135   : > { %v480_v54 = vpop.f32.mrf.mxu2 }
 0x136   : > { %v494_v55 = vpack.c.bf16 %v480_v54, %v480_v54 }
 0x138   : > { %503 = vst.msk [vmem:[%s873_s22 + $0x10] sm:$0xf] %vm498_vm10, %v494_v55  ;;  %555 = vrot.lane.b32.xlu0 %v494_v55, %s792_s25 }
 0x13c   : > { %523 = vrot.lane.b32.xlu2 %v494_v55, %s791_s23  ;;  %521 = vrot.lane.b32.xlu1 %v493_v53, %s791_s23 }
 0x13d   : > { %v482_v56 = vpop.f32.mrf.mxu2 }
 0x13e   : > { %v495_v57 = vpack.c.bf16 %v482_v56, %v482_v56 }
 0x140   : > { %504 = vst.msk [vmem:[%s873_s22 + $0x14] sm:$0xf] %vm498_vm10, %v495_v57 }
 0x144   : > { %525 = vrot.lane.b32.xlu2 %v495_v57, %s791_s23 }
 0x145   : > { %v485_v58 = vpop.f32.mrf.mxu2 }
 0x146   : > { %v496_v59 = vpack.c.bf16 %v485_v58, %v485_v58 }
 0x148   : > { %505 = vst.msk [vmem:[%s873_s22 + $0x18] sm:$0xf] %vm498_vm10, %v496_v59  ;;  %527 = vrot.lane.b32.xlu0 %v496_v59, %s791_s23 }
 0x14c   : > { %559 = vrot.lane.b32.xlu2 %v496_v59, %s792_s25 }
 0x14d   : > { %v487_v60 = vpop.f32.mrf.mxu2 }
 0x14e   : > { %v497_v61 = vpack.c.bf16 %v487_v60, %v487_v60 }
 0x150   : > { %506 = vst.msk [vmem:[%s873_s22 + $0x1c] sm:$0xf] %vm498_vm10, %v497_v61  ;;  %561 = vrot.lane.b32.xlu0 %v497_v61, %s792_s25  ;;  %529 = vrot.lane.b32.xlu1 %v497_v61, %s791_s23 }
 0x158   : > { %557 = vrot.lane.b32.xlu1 %v495_v57, %s792_s25 }
 0x176   : > { %v548_v62 = vpop.permute.xlu2 %547 }
 0x177   : > { %572 = vst.msk [vmem:[%s911_s28] sm:$0xf] %vm571_vm11, %v548_v62 }
 0x18e   : > { %v516_v63 = vpop.permute.xlu0 %515  ;;  %v554_v0 = vpop.permute.xlu2 %553 }
 0x18f   : > { %539 = vst.msk [vmem:[%s301_s9] sm:$0xf] %vm498_vm10, %v516_v63 }
 0x190   : > { %575 = vst.msk [vmem:[%s911_s28 + $0xc] sm:$0xf] %vm571_vm11, %v554_v0 }
 0x196   : > { %v518_v1 = vpop.permute.xlu0 %517  ;;  %v524_v2 = vpop.permute.xlu2 %523 }
 0x197   : > { %540 = vst.msk [vmem:[%s301_s9 + $0x4] sm:$0xf] %vm498_vm10, %v518_v1 }
 0x198   : > { %543 = vst.msk [vmem:[%s301_s9 + $0x10] sm:$0xf] %vm498_vm10, %v524_v2 }
 0x19e   : > { %v550_v3 = vpop.permute.xlu0 %549  ;;  %v520_v4 = vpop.permute.xlu1 %519 }
 0x19f   : > { %573 = vst.msk [vmem:[%s911_s28 + $0x4] sm:$0xf] %vm571_vm11, %v550_v3  ;;  %v526_v5 = vpop.permute.xlu2 %525 }
 0x1a0   : > { %541 = vst.msk [vmem:[%s301_s9 + $0x8] sm:$0xf] %vm498_vm10, %v520_v4 }
 0x1a1   : > { %544 = vst.msk [vmem:[%s301_s9 + $0x14] sm:$0xf] %vm498_vm10, %v526_v5 }
 0x1a6   : > { %v552_v6 = vpop.permute.xlu1 %551 }
 0x1a7   : > { %574 = vst.msk [vmem:[%s911_s28 + $0x8] sm:$0xf] %vm571_vm11, %v552_v6  ;;  %v560_v7 = vpop.permute.xlu2 %559 }
 0x1a8   : > { %578 = vst.msk [vmem:[%s911_s28 + $0x18] sm:$0xf] %vm571_vm11, %v560_v7 }
 0x1aa   : > { %v556_v8 = vpop.permute.xlu0 %555 }
 0x1ab   : > { %576 = vst.msk [vmem:[%s911_s28 + $0x10] sm:$0xf] %vm571_vm11, %v556_v8 }
 0x1ae   : > { %v522_v9 = vpop.permute.xlu1 %521 }
 0x1af   : > { %542 = vst.msk [vmem:[%s301_s9 + $0xc] sm:$0xf] %vm498_vm10, %v522_v9 }
 0x1ba   : > { %v528_v10 = vpop.permute.xlu0 %527 }
 0x1bb   : > { %545 = vst.msk [vmem:[%s301_s9 + $0x18] sm:$0xf] %vm498_vm10, %v528_v10 }
 0x1c2   : > { %v562_v11 = vpop.permute.xlu0 %561  ;;  %v530_v12 = vpop.permute.xlu1 %529 }
 0x1c3   : > { %579 = vst.msk [vmem:[%s911_s28 + $0x1c] sm:$0xf] %vm571_vm11, %v562_v11 }
 0x1c4   : > { %546 = vst.msk [vmem:[%s301_s9 + $0x1c] sm:$0xf] %vm498_vm10, %v530_v12 }
 0x1ca   : > { %v558_v13 = vpop.permute.xlu1 %557 }
 0x1cb   : > { %577 = vst.msk [vmem:[%s911_s28 + $0x14] sm:$0xf] %vm571_vm11, %v558_v13 }
 0x1cc PF: > { %s18_s24 = sadd.s32 1, %s789_s24  }
 0x1cd   : > { %p15_p4 = scmp.ge.s32.totalorder %s18_s24, 4  }
 0x1cf   :  { %17 = sbr.rel (!%p15_p4) target bundleno = 1 (0x1), region = 94 }

</bundles_post_ra>
